<compile_context>
chip_gen: v6e
topology: v6e:2x2x1
jax: 0.10.0
libtpu: 0.0.40
codegen_flags: <defaults>
</compile_context>

<pallas_src>
import jax
import jax.numpy as jnp
from jax.experimental import pallas as pl
from jax.experimental.pallas import tpu as pltpu

_BN_EPS = 1e-5


# ----------------------------------------------------------------------------
# Generation-aware VMEM budgets
# ----------------------------------------------------------------------------
def _tpu_vmem_capacity_bytes():
    try:
        info = pltpu.get_tpu_info()
        cap = int(getattr(info, "vmem_capacity_bytes", 0))
        if cap > 0:
            return cap
    except Exception:
        pass
    return 64 * 1024 * 1024  # conservative fallback (v7x per-core VMEM)


_VMEM_CAP = _tpu_vmem_capacity_bytes()
_VMEM_LIMIT = max(32 * 1024 * 1024,
                  min(int(_VMEM_CAP * 0.75), _VMEM_CAP - 8 * 1024 * 1024))


def _step_vmem_bytes(rows, d):
    """Honest per-grid-step working-set estimate (double-buffered)."""
    io = 2 * 2 * rows * d * 4      # f32 x block + f32 out block, 2-deep
    w = 2 * 2 * d * d * 2          # bf16 W1^T + W2^T, 2-deep
    vec = 2 * 4 * d * 4            # biases / gamma / beta / a / c
    tmp = 4 * rows * d * 4         # h, centered h, bf16 staging, slack
    return io + w + vec + tmp + (1 << 20)


# ----------------------------------------------------------------------------
# In-kernel math helpers
# ----------------------------------------------------------------------------
def _mish(x):
    """mish(x) = x * tanh(softplus(x)) = x * n / (n + 2), n = e^x (e^x + 2).

    Single transcendental (exp) + exact divide, so the result tracks torch's
    mish to f32 precision even after BatchNorm's 1/std amplification.  The
    clamp at 20 keeps e^x finite; for x > 20 the rational factor is exactly 1
    in f32, giving mish(x) = x as required.
    """
    u = jnp.exp(jnp.minimum(x, 20.0))
    n = u * (u + 2.0)
    return x * (n / (n + 2.0))


def _two_layer(x_ref, w1_ref, b1_ref, w2_ref, b2_ref):
    """Linear -> Mish -> Linear -> Mish.

    x arrives in f32 (no wrapper-side cast => no extra HBM pass); it is cast to
    bf16 on the VPU right before the MXU.  Accumulation and all element-wise /
    transcendental math stay in f32 (v5e has no bf16 VPU/EUP).
    """
    x = x_ref[...].astype(jnp.bfloat16)
    h = jnp.dot(x, w1_ref[...], preferred_element_type=jnp.float32)
    h = _mish(h + b1_ref[...])
    h = jnp.dot(h.astype(jnp.bfloat16), w2_ref[...],
                preferred_element_type=jnp.float32)
    return _mish(h + b2_ref[...])


# ----------------------------------------------------------------------------
# Kernels
# ----------------------------------------------------------------------------
def _fused_kernel(x_ref, w1_ref, b1_ref, w2_ref, b2_ref, gamma_ref, beta_ref,
                  o_ref):
    """Whole (per-branch) batch resident: 2x(Linear+Mish) + in-kernel BN."""
    h = _two_layer(x_ref, w1_ref, b1_ref, w2_ref, b2_ref)
    inv_n = 1.0 / h.shape[0]
    mean = jnp.sum(h, axis=0, keepdims=True) * inv_n
    xc = h - mean
    var = jnp.maximum(jnp.sum(xc * xc, axis=0, keepdims=True) * inv_n, 0.0)
    a = gamma_ref[...] * jax.lax.rsqrt(var + _BN_EPS)
    o_ref[...] = (xc * a + beta_ref[...]).astype(o_ref.dtype)


def _hidden_stats_kernel(x_ref, w1_ref, b1_ref, w2_ref, b2_ref,
                         sum_ref, sumsq_ref):
    """Tiled pass 1: per-(branch, tile) partial sum / sum-of-squares only.
    The hidden activations never touch HBM (recomputed in pass 2)."""
    h = _two_layer(x_ref, w1_ref, b1_ref, w2_ref, b2_ref)
    sum_ref[...] = jnp.sum(h, axis=0, keepdims=True)
    sumsq_ref[...] = jnp.sum(h * h, axis=0, keepdims=True)


def _bn_apply_kernel(x_ref, w1_ref, b1_ref, w2_ref, b2_ref, a_ref, c_ref,
                     o_ref):
    """Tiled pass 2: recompute the two layers, apply folded BN: y = h*a + c."""
    h = _two_layer(x_ref, w1_ref, b1_ref, w2_ref, b2_ref)
    o_ref[...] = (h * a_ref[...] + c_ref[...]).astype(o_ref.dtype)


# ----------------------------------------------------------------------------
# Parameter prep (hoisted out of the per-call path)
# ----------------------------------------------------------------------------
def prepare_params(params):
    """One-time weight prep: transpose + bf16 cast.  Call once, reuse."""
    if "w1_t" in params:
        return params
    d = params["w1"].shape[0]
    return {
        "w1_t": jnp.asarray(params["w1"]).T.astype(jnp.bfloat16),
        "w2_t": jnp.asarray(params["w2"]).T.astype(jnp.bfloat16),
        "b1": jnp.asarray(params["b1"]).reshape(1, d).astype(jnp.float32),
        "b2": jnp.asarray(params["b2"]).reshape(1, d).astype(jnp.float32),
        "gamma": jnp.asarray(params["gamma"]).reshape(1, d).astype(jnp.float32),
        "beta": jnp.asarray(params["beta"]).reshape(1, d).astype(jnp.float32),
    }


# ----------------------------------------------------------------------------
# Wrappers
# ----------------------------------------------------------------------------
def _encode_fused(x3, prep):
    g_br, n, d = x3.shape

    def branch_spec():
        return pl.BlockSpec((pl.Squeezed(), n, d), lambda g: (g, 0, 0))

    def const_spec(shape):
        return pl.BlockSpec(shape, lambda g: (0, 0))

    return pl.pallas_call(
        _fused_kernel,
        out_shape=jax.ShapeDtypeStruct((g_br, n, d), jnp.float32),
        grid=(g_br,),
        in_specs=[
            branch_spec(),        # x (one branch per grid step, f32)
            const_spec((d, d)),   # W1^T (bf16, VMEM-resident across branches)
            const_spec((1, d)),   # b1
            const_spec((d, d)),   # W2^T
            const_spec((1, d)),   # b2
            const_spec((1, d)),   # gamma
            const_spec((1, d)),   # beta
        ],
        out_specs=branch_spec(),
        compiler_params=pltpu.CompilerParams(
            dimension_semantics=("parallel",),
            vmem_limit_bytes=_VMEM_LIMIT),
    )(x3, prep["w1_t"], prep["b1"], prep["w2_t"], prep["b2"],
      prep["gamma"], prep["beta"])


def _encode_tiled(x3, prep, block_rows):
    g_br, n, d = x3.shape
    assert n % block_rows == 0 and block_rows % 8 == 0
    num_tiles = n // block_rows

    def tile_spec():
        return pl.BlockSpec((pl.Squeezed(), block_rows, d),
                            lambda g, t: (g, t, 0))

    def part_stat_spec():  # (G, T, 1, D): per-(branch, tile) partial stats
        return pl.BlockSpec((pl.Squeezed(), pl.Squeezed(), 1, d),
                            lambda g, t: (g, t, 0, 0))

    def bn_spec():         # (G, 1, D): folded affine, per branch
        return pl.BlockSpec((pl.Squeezed(), 1, d), lambda g, t: (g, 0, 0))

    def const_spec(shape):
        return pl.BlockSpec(shape, lambda g, t: (0, 0))

    weight_specs = [const_spec((d, d)), const_spec((1, d)),
                    const_spec((d, d)), const_spec((1, d))]
    weight_args = (prep["w1_t"], prep["b1"], prep["w2_t"], prep["b2"])
    cparams = pltpu.CompilerParams(
        dimension_semantics=("parallel", "parallel"),
        vmem_limit_bytes=_VMEM_LIMIT)

    # Pass 1: partial sum / sumsq per tile; both axes "parallel" (v7x: tiles
    # shard onto both TensorCores).  No hidden-activation HBM traffic.
    part_s, part_ss = pl.pallas_call(
        _hidden_stats_kernel,
        out_shape=(jax.ShapeDtypeStruct((g_br, num_tiles, 1, d), jnp.float32),
                   jax.ShapeDtypeStruct((g_br, num_tiles, 1, d), jnp.float32)),
        grid=(g_br, num_tiles),
        in_specs=[tile_spec()] + weight_specs,
        out_specs=(part_stat_spec(), part_stat_spec()),
        compiler_params=cparams,
    )(x3, *weight_args)

    # Tiny JAX epilogue: exact full-batch (biased) stats per branch, folded
    # into y = h*a + c.  Clamp variance against f32 cancellation.
    s = jnp.sum(part_s, axis=1)          # (G, 1, D)
    ss = jnp.sum(part_ss, axis=1)        # (G, 1, D)
    mean = s / n
    var = jnp.maximum(ss / n - mean * mean, 0.0)
    a = prep["gamma"][None] * jax.lax.rsqrt(var + _BN_EPS)   # (G, 1, D)
    c = prep["beta"][None] - mean * a                        # (G, 1, D)

    # Pass 2: recompute the two layers (MXU hides under the x DMA for small /
    # mid D) and apply the folded affine.
    return pl.pallas_call(
        _bn_apply_kernel,
        out_shape=jax.ShapeDtypeStruct((g_br, n, d), jnp.float32),
        grid=(g_br, num_tiles),
        in_specs=[tile_spec()] + weight_specs + [bn_spec(), bn_spec()],
        out_specs=tile_spec(),
        compiler_params=cparams,
    )(x3, *weight_args, a, c)


def _pick_block_rows(n, d, target):
    for bm in [target, 2048, 1024, 512, 256, 128, 64, 32, 16, 8]:
        if (bm and 0 < bm <= n and n % bm == 0 and bm % 8 == 0
                and _step_vmem_bytes(bm, d) <= _VMEM_LIMIT):
            return bm
    return None


def rere_triplet_forward(x, params, *, mode="auto", block_rows=None):
    """Forward pass of RereTripletNetwork.dml_module.

    x: [N, D] (single batch, like module.forward) or [G, N, D] (G independent
    batches, e.g. the 3 triplet branches).  BatchNorm statistics are computed
    per leading-axis slice — identical to G separate forward() calls.
    """
    prep = prepare_params(params)
    squeeze = x.ndim == 2
    x3 = (x[None] if squeeze else x).astype(jnp.float32)
    _, n, d = x3.shape

    if block_rows is None:
        block_rows = 2048 if _VMEM_CAP >= (96 << 20) else 1024

    fused_fits = _step_vmem_bytes(n, d) <= _VMEM_LIMIT
    if mode == "fused" or (mode == "auto" and fused_fits):
        out = _encode_fused(x3, prep)
    else:
        bm = _pick_block_rows(n, d, block_rows)
        if bm is None:
            if mode == "tiled":
                raise ValueError(
                    f"tiled path needs N divisible by a multiple of 8 that "
                    f"fits VMEM; got N={n}, D={d}")
            out = _encode_fused(x3, prep)
        else:
            out = _encode_tiled(x3, prep, bm)
    return out[0] if squeeze else out


def encode_triplet(x_anchor, x_pos, x_neg, params):
    """Encode all three triplet branches with ONE kernel launch; weights are
    fetched once and stay VMEM-resident.  Numerically identical to three
    independent forward() calls (per-branch BatchNorm statistics)."""
    out = rere_triplet_forward(jnp.stack([x_anchor, x_pos, x_neg], axis=0),
                               params)
    return out[0], out[1], out[2]


# ----------------------------------------------------------------------------
# Parameters & plain-JAX reference
# ----------------------------------------------------------------------------
def init_params(key, d_in):
    """Deterministic init mirroring nn.Linear default (uniform +-1/sqrt(d_in))
    and nn.BatchNorm1d default (gamma=1, beta=0)."""
    k1, k2, k3, k4 = jax.random.split(key, 4)
    bound = 1.0 / jnp.sqrt(jnp.float32(d_in))
    return {
        "w1": jax.random.uniform(k1, (d_in, d_in), jnp.float32, -bound, bound),
        "b1": jax.random.uniform(k2, (d_in,), jnp.float32, -bound, bound),
        "w2": jax.random.uniform(k3, (d_in, d_in), jnp.float32, -bound, bound),
        "b2": jax.random.uniform(k4, (d_in,), jnp.float32, -bound, bound),
        "gamma": jnp.ones((d_in,), jnp.float32),
        "beta": jnp.zeros((d_in,), jnp.float32),
    }


def _reference(x, params, mxu_dtype=jnp.float32):
    """Plain-JAX reference.  mxu_dtype=bfloat16 emulates the kernel's bf16 MXU
    inputs (f32 accumulation) for a tight numerical comparison."""
    def mish(v):
        sp = jnp.where(v > 20.0, v, jnp.log1p(jnp.exp(jnp.minimum(v, 20.0))))
        return v * jnp.tanh(sp)

    def cast(a):
        if mxu_dtype == jnp.float32:
            return a
        return a.astype(mxu_dtype).astype(jnp.float32)

    h = cast(x) @ cast(params["w1"].T) + params["b1"]
    h = mish(h)
    h = cast(h) @ cast(params["w2"].T) + params["b2"]
    h = mish(h)
    mean = jnp.mean(h, axis=0, keepdims=True)
    var = jnp.mean((h - mean) ** 2, axis=0, keepdims=True)
    y = (h - mean) / jnp.sqrt(var + _BN_EPS)
    return y * params["gamma"] + params["beta"]


# ----------------------------------------------------------------------------
# Demo / self-test
# ----------------------------------------------------------------------------
if __name__ == "__main__":
    N, D_IN = 8, 32
    key = jax.random.PRNGKey(0)
    kx, kp, kt, kg, kb, kbig = jax.random.split(key, 6)

    params = init_params(kp, D_IN)
    # Non-default BN affine so the folded y = h*a + c path is actually used.
    params["gamma"] = 1.0 + 0.1 * jax.random.normal(kg, (D_IN,), jnp.float32)
    params["beta"] = 0.1 * jax.random.normal(kb, (D_IN,), jnp.float32)
    prepped = prepare_params(params)   # hoisted weight prep (done once)

    # 1) plain forward (fused single-call path)
    x = jax.random.normal(kx, (N, D_IN), jnp.float32)
    out = jax.block_until_ready(rere_triplet_forward(x, prepped))
    assert out.shape == (N, D_IN)
    ref_bf16 = _reference(x, params, jnp.bfloat16)
    max_err = float(jnp.max(jnp.abs(out - ref_bf16)))
    assert jnp.allclose(out, ref_bf16, atol=1e-2, rtol=1e-2), (
        f"mismatch vs bf16 ref (max abs err {max_err})")
    ref_f32 = _reference(x, params)
    rel = jnp.linalg.norm(out - ref_f32) / jnp.linalg.norm(ref_f32)
    assert rel < 5e-2, f"relative error vs f32 reference too large: {rel}"

    # 2) fused triplet encode: 3 branches, one launch, weights VMEM-resident.
    xs3 = jax.random.normal(kt, (3, N, D_IN), jnp.float32)
    oa, opos, oneg = encode_triplet(xs3[0], xs3[1], xs3[2], prepped)
    jax.block_until_ready(oneg)
    for o_b, x_b in zip((oa, opos, oneg), (xs3[0], xs3[1], xs3[2])):
        assert jnp.allclose(o_b, _reference(x_b, params, jnp.bfloat16),
                            atol=1e-2, rtol=1e-2), "triplet branch mismatch"

    # 3) tiled two-pass-BN path (partial stats + recompute, no h round trip).
    NB = 256
    xb = jax.random.normal(kbig, (NB, D_IN), jnp.float32)
    outb = jax.block_until_ready(
        rere_triplet_forward(xb, prepped, mode="tiled", block_rows=64))
    assert jnp.allclose(outb, _reference(xb, params, jnp.bfloat16),
                        atol=1e-2, rtol=1e-2), "tiled path mismatch"

    print("KERNEL_OK")
</pallas_src>

<mosaic_0001>
module attributes {stable_mosaic.version = 11 : i64} {
  func.func @_fused_kernel(%arg0: i32, %arg1: memref<1x8x32xf32, #tpu.memory_space<vmem>>, %arg2: memref<32x32xbf16, #tpu.memory_space<vmem>>, %arg3: memref<1x32xf32, #tpu.memory_space<vmem>>, %arg4: memref<32x32xbf16, #tpu.memory_space<vmem>>, %arg5: memref<1x32xf32, #tpu.memory_space<vmem>>, %arg6: memref<1x32xf32, #tpu.memory_space<vmem>>, %arg7: memref<1x32xf32, #tpu.memory_space<vmem>>, %arg8: memref<1x8x32xf32, #tpu.memory_space<vmem>>) attributes {dimension_semantics = [#tpu.dimension_semantics<parallel>], iteration_bounds = array<i64: 1>, scalar_prefetch = 0 : i64, scratch_operands = 0 : i64, tpu.core_type = #tpu.core_type<tc>, window_params = [{transform_indices = @transform_0, window_bounds = array<i64: 1, 8, 32>}, {pipeline_mode = #tpu.pipeline_mode<synchronous>, transform_indices = @transform_1, window_bounds = array<i64: 32, 32>}, {pipeline_mode = #tpu.pipeline_mode<synchronous>, transform_indices = @transform_2, window_bounds = array<i64: 1, 32>}, {pipeline_mode = #tpu.pipeline_mode<synchronous>, transform_indices = @transform_3, window_bounds = array<i64: 32, 32>}, {pipeline_mode = #tpu.pipeline_mode<synchronous>, transform_indices = @transform_4, window_bounds = array<i64: 1, 32>}, {pipeline_mode = #tpu.pipeline_mode<synchronous>, transform_indices = @transform_5, window_bounds = array<i64: 1, 32>}, {pipeline_mode = #tpu.pipeline_mode<synchronous>, transform_indices = @transform_6, window_bounds = array<i64: 1, 32>}, {transform_indices = @transform_7, window_bounds = array<i64: 1, 8, 32>}]} {
    %c0 = arith.constant 0 : index
    %c0_0 = arith.constant 0 : index
    %c0_1 = arith.constant 0 : index
    %0 = vector.load %arg1[%c0, %c0_0, %c0_1] : memref<1x8x32xf32, #tpu.memory_space<vmem>>, vector<1x8x32xf32>
    %1 = vector.shape_cast %0 : vector<1x8x32xf32> to vector<8x32xf32>
    %2 = arith.truncf %1 : vector<8x32xf32> to vector<8x32xbf16>
    %c0_2 = arith.constant 0 : index
    %c0_3 = arith.constant 0 : index
    %3 = vector.load %arg2[%c0_2, %c0_3] : memref<32x32xbf16, #tpu.memory_space<vmem>>, vector<32x32xbf16>
    %cst = arith.constant dense<0.000000e+00> : vector<8x32xf32>
    %4 = tpu.matmul %2, %3, %cst {dimension_numbers = #tpu.dot_dimension_numbers<[1], [0], [0], [1], [0, 0, 1, 1], [], []>} : vector<8x32xbf16>, vector<32x32xbf16>, vector<8x32xf32> -> vector<8x32xf32>
    %c0_4 = arith.constant 0 : index
    %c0_5 = arith.constant 0 : index
    %5 = vector.load %arg3[%c0_4, %c0_5] : memref<1x32xf32, #tpu.memory_space<vmem>>, vector<1x32xf32>
    %6 = vector.broadcast %5 : vector<1x32xf32> to vector<8x32xf32>
    %7 = arith.addf %4, %6 : vector<8x32xf32>
    %cst_6 = arith.constant 2.000000e+01 : f32
    %8 = vector.broadcast %cst_6 : f32 to vector<8x32xf32>
    %9 = arith.minimumf %7, %8 : vector<8x32xf32>
    %10 = math.exp %9 : vector<8x32xf32>
    %cst_7 = arith.constant 2.000000e+00 : f32
    %11 = vector.broadcast %cst_7 : f32 to vector<8x32xf32>
    %12 = arith.addf %10, %11 : vector<8x32xf32>
    %13 = arith.mulf %10, %12 : vector<8x32xf32>
    %cst_8 = arith.constant 2.000000e+00 : f32
    %14 = vector.broadcast %cst_8 : f32 to vector<8x32xf32>
    %15 = arith.addf %13, %14 : vector<8x32xf32>
    %16 = arith.divf %13, %15 : vector<8x32xf32>
    %17 = arith.mulf %7, %16 : vector<8x32xf32>
    %18 = arith.truncf %17 : vector<8x32xf32> to vector<8x32xbf16>
    %c0_9 = arith.constant 0 : index
    %c0_10 = arith.constant 0 : index
    %19 = vector.load %arg4[%c0_9, %c0_10] : memref<32x32xbf16, #tpu.memory_space<vmem>>, vector<32x32xbf16>
    %cst_11 = arith.constant dense<0.000000e+00> : vector<8x32xf32>
    %20 = tpu.matmul %18, %19, %cst_11 {dimension_numbers = #tpu.dot_dimension_numbers<[1], [0], [0], [1], [0, 0, 1, 1], [], []>} : vector<8x32xbf16>, vector<32x32xbf16>, vector<8x32xf32> -> vector<8x32xf32>
    %c0_12 = arith.constant 0 : index
    %c0_13 = arith.constant 0 : index
    %21 = vector.load %arg5[%c0_12, %c0_13] : memref<1x32xf32, #tpu.memory_space<vmem>>, vector<1x32xf32>
    %22 = vector.broadcast %21 : vector<1x32xf32> to vector<8x32xf32>
    %23 = arith.addf %20, %22 : vector<8x32xf32>
    %cst_14 = arith.constant 2.000000e+01 : f32
    %24 = vector.broadcast %cst_14 : f32 to vector<8x32xf32>
    %25 = arith.minimumf %23, %24 : vector<8x32xf32>
    %26 = math.exp %25 : vector<8x32xf32>
    %cst_15 = arith.constant 2.000000e+00 : f32
    %27 = vector.broadcast %cst_15 : f32 to vector<8x32xf32>
    %28 = arith.addf %26, %27 : vector<8x32xf32>
    %29 = arith.mulf %26, %28 : vector<8x32xf32>
    %cst_16 = arith.constant 2.000000e+00 : f32
    %30 = vector.broadcast %cst_16 : f32 to vector<8x32xf32>
    %31 = arith.addf %29, %30 : vector<8x32xf32>
    %32 = arith.divf %29, %31 : vector<8x32xf32>
    %33 = arith.mulf %23, %32 : vector<8x32xf32>
    %cst_17 = arith.constant dense<0.000000e+00> : vector<32xf32>
    %34 = vector.multi_reduction <add>, %33, %cst_17 [0] : vector<8x32xf32> to vector<32xf32>
    %35 = vector.shape_cast %34 : vector<32xf32> to vector<1x32xf32>
    %cst_18 = arith.constant 1.250000e-01 : f32
    %36 = vector.broadcast %cst_18 : f32 to vector<1x32xf32>
    %37 = arith.mulf %35, %36 : vector<1x32xf32>
    %38 = vector.broadcast %37 : vector<1x32xf32> to vector<8x32xf32>
    %39 = arith.subf %33, %38 : vector<8x32xf32>
    %40 = arith.mulf %39, %39 : vector<8x32xf32>
    %cst_19 = arith.constant dense<0.000000e+00> : vector<32xf32>
    %41 = vector.multi_reduction <add>, %40, %cst_19 [0] : vector<8x32xf32> to vector<32xf32>
    %42 = vector.shape_cast %41 : vector<32xf32> to vector<1x32xf32>
    %cst_20 = arith.constant 1.250000e-01 : f32
    %43 = vector.broadcast %cst_20 : f32 to vector<1x32xf32>
    %44 = arith.mulf %42, %43 : vector<1x32xf32>
    %cst_21 = arith.constant 0.000000e+00 : f32
    %45 = vector.broadcast %cst_21 : f32 to vector<1x32xf32>
    %46 = arith.maximumf %44, %45 : vector<1x32xf32>
    %c0_22 = arith.constant 0 : index
    %c0_23 = arith.constant 0 : index
    %47 = vector.load %arg6[%c0_22, %c0_23] : memref<1x32xf32, #tpu.memory_space<vmem>>, vector<1x32xf32>
    %cst_24 = arith.constant 9.99999974E-6 : f32
    %48 = vector.broadcast %cst_24 : f32 to vector<1x32xf32>
    %49 = arith.addf %46, %48 : vector<1x32xf32>
    %50 = math.rsqrt %49 : vector<1x32xf32>
    %51 = arith.mulf %47, %50 : vector<1x32xf32>
    %52 = vector.broadcast %51 : vector<1x32xf32> to vector<8x32xf32>
    %53 = arith.mulf %39, %52 : vector<8x32xf32>
    %c0_25 = arith.constant 0 : index
    %c0_26 = arith.constant 0 : index
    %54 = vector.load %arg7[%c0_25, %c0_26] : memref<1x32xf32, #tpu.memory_space<vmem>>, vector<1x32xf32>
    %55 = vector.broadcast %54 : vector<1x32xf32> to vector<8x32xf32>
    %56 = arith.addf %53, %55 : vector<8x32xf32>
    %c0_27 = arith.constant 0 : index
    %c0_28 = arith.constant 0 : index
    %c0_29 = arith.constant 0 : index
    %57 = vector.load %arg8[%c0_27, %c0_28, %c0_29] : memref<1x8x32xf32, #tpu.memory_space<vmem>>, vector<1x8x32xf32>
    %58 = vector.shape_cast %57 : vector<1x8x32xf32> to vector<8x32xf32>
    %59 = vector.shape_cast %56 : vector<8x32xf32> to vector<1x8x32xf32>
    tpu.vector_store %arg8[%c0_27, %c0_28, %c0_29], %59 {strides = array<i32>} : memref<1x8x32xf32, #tpu.memory_space<vmem>>, vector<1x8x32xf32>,
    return
  }
  func.func @transform_0(%arg0: i32) -> (i32, i32, i32) {
    %c0_i32 = arith.constant 0 : i32
    %c0_i32_0 = arith.constant 0 : i32
    %c0_i32_1 = arith.constant 0 : i32
    return %arg0, %c0_i32, %c0_i32_0 : i32, i32, i32
  }
  func.func @transform_1(%arg0: i32) -> (i32, i32) {
    %c0_i32 = arith.constant 0 : i32
    %c0_i32_0 = arith.constant 0 : i32
    %c0_i32_1 = arith.constant 0 : i32
    return %c0_i32, %c0_i32_0 : i32, i32
  }
  func.func @transform_2(%arg0: i32) -> (i32, i32) {
    %c0_i32 = arith.constant 0 : i32
    %c0_i32_0 = arith.constant 0 : i32
    %c0_i32_1 = arith.constant 0 : i32
    return %c0_i32, %c0_i32_0 : i32, i32
  }
  func.func @transform_3(%arg0: i32) -> (i32, i32) {
    %c0_i32 = arith.constant 0 : i32
    %c0_i32_0 = arith.constant 0 : i32
    %c0_i32_1 = arith.constant 0 : i32
    return %c0_i32, %c0_i32_0 : i32, i32
  }
  func.func @transform_4(%arg0: i32) -> (i32, i32) {
    %c0_i32 = arith.constant 0 : i32
    %c0_i32_0 = arith.constant 0 : i32
    %c0_i32_1 = arith.constant 0 : i32
    return %c0_i32, %c0_i32_0 : i32, i32
  }
  func.func @transform_5(%arg0: i32) -> (i32, i32) {
    %c0_i32 = arith.constant 0 : i32
    %c0_i32_0 = arith.constant 0 : i32
    %c0_i32_1 = arith.constant 0 : i32
    return %c0_i32, %c0_i32_0 : i32, i32
  }
  func.func @transform_6(%arg0: i32) -> (i32, i32) {
    %c0_i32 = arith.constant 0 : i32
    %c0_i32_0 = arith.constant 0 : i32
    %c0_i32_1 = arith.constant 0 : i32
    return %c0_i32, %c0_i32_0 : i32, i32
  }
  func.func @transform_7(%arg0: i32) -> (i32, i32, i32) {
    %c0_i32 = arith.constant 0 : i32
    %c0_i32_0 = arith.constant 0 : i32
    %c0_i32_1 = arith.constant 0 : i32
    return %arg0, %c0_i32, %c0_i32_0 : i32, i32, i32
  }
}

</mosaic_0001>

<bundles_post_ra>
// kernel: tpu_custom_call.1
= control target key start
LH: loop header
LB: loop body
LE: loop exit
PB: predicated region body
PF: predicated region fallthrough
CT: control target
= control target key end

     0   :  { %12 = vsyncpa [#allocation3], 0  ;;  %s492_s0 = inlined_call_operand.hbm [shape: f32[1,8,32], index: 0, kind: input, shape index: {}]   ;;  %s493_s1 = inlined_call_operand.hbm [shape: bf16[32,32], index: 1, kind: input, shape index: {}]   ;;  %s494_s2 = inlined_call_operand.vmem [shape: f32[1,32], index: 2, kind: input, shape index: {}]   ;;  %s495_s3 = inlined_call_operand.hbm [shape: bf16[32,32], index: 3, kind: input, shape index: {}]   ;;  %s496_s4 = inlined_call_operand.vmem [shape: f32[1,32], index: 4, kind: input, shape index: {}]   ;;  %s497_s5 = inlined_call_operand.vmem [shape: f32[1,32], index: 5, kind: input, shape index: {}]   ;;  %s498_s6 = inlined_call_operand.vmem [shape: f32[1,32], index: 6, kind: input, shape index: {}]   ;;  %s499_s7 = inlined_call_operand.hbm [shape: f32[1,8,32], index: 7, kind: output, shape index: {}]  }
   0x1   :  { %13 = vsyncpa [#allocation6], 0 }
   0x2   :  { %14 = vsyncpa [#allocation4], 0  ;;  %s415_s24 = smov [#allocation5]  }
   0x3   :  { %s30_s25 = sshll.u32 %s415_s24, 4  ;;  %s31_s25 = int_to_ptr.vmem [resolvable:$true] %s30_s25 }
   0x4   :  { %s337_s26 = scalar_lea.vmem %s31_s25, 256  ;;  %p342_p1 = scmp.lt.s32.totalorder %s31_s25, %s31_s25 }
   0x5   :  { %p338_p0 = scmp.ne.s32.totalorder %s31_s25, %s337_s26  ;;  %p343_p2 = scmp.lt.s32.totalorder %s337_s26, %s337_s26 }
   0x7   :  { %p344_p3 = por %p343_p2, %p342_p1 }
   0x9   :  { %p345_p4 = pnand %p344_p3, %p338_p0 }
   0xb   :  { %348 = shalt.err (!%p345_p4)
}
   0xc   :  { %s416_s27 = smov 64   ;;  %s417_s28 = smov 4  }
   0xd   :  { %36 = dma.hbm_to_vmem [thread:$0]  %s493_s1, 256, %s31_s25, [#allocation6], %s416_s27, %s416_s27, %s417_s28  }
   0xe   :  { %s418_s8 = smov [#allocation2]   ;;  %s419_s10 = smov [#allocation7]  }
   0xf   :  { %s21_s9 = sshll.u32 %s418_s8, 4  ;;  %s44_s11 = sshll.u32 %s419_s10, 4  ;;  %s22_s9 = int_to_ptr.vmem [resolvable:$true] %s21_s9  ;;  %s45_s11 = int_to_ptr.vmem [resolvable:$true] %s44_s11 }
  0x10   :  { %s357_s12 = scalar_lea.vmem %s22_s9, 128  ;;  %p362_p6 = scmp.lt.s32.totalorder %s22_s9, %s22_s9 }
  0x11   :  { %p358_p5 = scmp.ne.s32.totalorder %s22_s9, %s357_s12  ;;  %p363_p7 = scmp.lt.s32.totalorder %s357_s12, %s357_s12 }
  0x13   :  { %p364_p8 = por %p363_p7, %p362_p6 }
  0x15   :  { %p365_p9 = pnand %p364_p8, %p358_p5 }
  0x17   :  { %368 = shalt.err (!%p365_p9)
}
  0x18   :  { %24 = dma.hbm_to_vmem [thread:$0]  %s492_s0, 128, %s22_s9, [#allocation3]  }
  0x19   :  { %s377_s15 = scalar_lea.vmem %s45_s11, 256  ;;  %p382_p11 = scmp.lt.s32.totalorder %s45_s11, %s45_s11 }
  0x1a   :  { %p378_p10 = scmp.ne.s32.totalorder %s45_s11, %s377_s15  ;;  %p383_p12 = scmp.lt.s32.totalorder %s377_s15, %s377_s15 }
  0x1c   :  { %p384_p13 = por %p383_p12, %p382_p11 }
  0x1e   :  { %p385_p0 = pnand %p384_p13, %p378_p10 }
  0x20   :  { %388 = shalt.err (!%p385_p0)
}
  0x21   :  { %50 = dma.hbm_to_vmem [thread:$0]  %s495_s3, 256, %s45_s11, [#allocation6], %s416_s27, %s416_s27, %s417_s28  }
  0x22   :  { %409 = dma.done.wait [#allocation3], 128  }
  0x23   :  { %410 = vsyncadd [#allocation3], 4294967168 }
  0x24   :  { %411 = dma.done.wait [#allocation6], 512  }
  0x25   :  { %412 = vsyncadd [#allocation6], 4294966784  ;;  %v420_v0 = vmov 0.0   ;;  %vm421_vm0 = vmmov 0   ;;  %v315_v1 = vld [vmem:[#allocation5 + $0x8] sm:$0xff]   ;;  %v316_v2 = vld [vmem:[#allocation5] sm:$0xff]   ;;  %v245_v58 = vlaneseq }
  0x26   :  { %291 = vmatprep.subr.bf16.mxu0 %v420_v0  ;;  %295 = vmatprep.mubr.msk.bf16.mxu0 %vm421_vm0, %v420_v0  ;;  %v67_v3 = vld [vmem:[#allocation2] sm:$0xff]  ;;  %vm92_vm1 = vcmask 261120   ;;  %v318_v6 = vld [vmem:[#allocation7] sm:$0xff]   ;;  %s422_s21 = smov [#allocation8]  }
  0x27   :  { %299 = vmatprep.subr.bf16.mxu1 %v420_v0  ;;  %303 = vmatprep.mubr.msk.bf16.mxu1 %vm421_vm0, %v420_v0  ;;  %v68_v4 = vpack.c.bf16 %v67_v3, %v67_v3  ;;  %v317_v5 = vld [vmem:[#allocation7 + $0x8] sm:$0xff]   ;;  %v246_v59 = vshrl.u32 %v245_v58, 7  ;;  %s266_s22 = sshll.u32 %s422_s21, 4  ;;  %s267_s22 = int_to_ptr.vmem [resolvable:$true] %s266_s22 }
  0x28   :  { %292 = vmatpush3.bf16.msra.mxu0 %v315_v1  ;;  %300 = vmatpush3.bf16.msra.mxu1 %v317_v5  ;;  %v276_v7 = vld [vmem:[%s494_s2] ss:$0 sm:$0xff]  ;;  %s389_s23 = scalar_lea.vmem %s267_s22, 128  ;;  %p394_p2 = scmp.lt.s32.totalorder %s267_s22, %s267_s22 }
  0x29   :  { %293 = vmatprep.subr.bf16.mxu0 %v420_v0  ;;  %301 = vmatprep.subr.bf16.mxu1 %v420_v0  ;;  %v280_v23 = vld [vmem:[%s496_s4] ss:$0 sm:$0xff]  ;;  %v247_v61 = vsub.s32 0, %v246_v59  ;;  %p390_p1 = scmp.ne.s32.totalorder %s267_s22, %s389_s23  ;;  %p395_p3 = scmp.lt.s32.totalorder %s389_s23, %s389_s23 }
  0x2a   :  { %v240_v60 = vld [vmem:[%s497_s5] sm:$0x1] }
  0x2b   :  { %v284_v1 = vld [vmem:[%s498_s6] ss:$0 sm:$0xff]  ;;  %p396_p4 = por %p395_p3, %p394_p2 }
  0x2c   :  { %294 = vmatpush3.bf16.msra.mxu0 %v316_v2  ;;  %302 = vmatpush3.bf16.msra.mxu1 %v318_v6 }
  0x2d   :  { %p397_p5 = pnand %p396_p4, %p390_p1 }
  0x2f   :  { %296 = vmatmul.mubr.msk.bf16.vlgmr.msra.gmra.mxu0 %vm92_vm1, %v68_v4 }
  0xef   :  { %v130_v8 = vpop.f32.mrf.mxu0 }
  0xf0   :  { %v131_v9 = vadd.f32 %v276_v7, %v130_v8 }
  0xf1   :  { %v297_v10 = vpop.f32.mrf.mxu0 }
  0xf2   :  { %v136_v11 = vmin.f32 %v131_v9, 20.0 }
  0xf3   :  { %v133_v12 = vpop.f32.mrf.mxu0 }
  0xf4   :  { %v137_v13 = vmul.f32 1.442695, %v136_v11 }
  0xf5   :  { %v298_v14 = vpop.f32.mrf.mxu0 }
  0xf6   :  { %319 = vpow2.f32 %v137_v13 }
 0x103   :  { %v320_v15 = vpop.eup %319 }
 0x104   :  { %v139_v16 = vadd.f32 2.0, %v320_v15 }
 0x106   :  { %v140_v17 = vmul.f32 %v320_v15, %v139_v16 }
 0x108   :  { %v141_v18 = vadd.f32 2.0, %v140_v17 }
 0x10a   :  { %321 = vrcp.f32 %v141_v18 }
 0x117   :  { %v322_v19 = vpop.eup %321 }
 0x118   :  { %v143_v20 = vmul.f32 %v322_v19, %v140_v17 }
 0x11a   :  { %v144_v21 = vmul.f32 %v143_v20, %v131_v9 }
 0x11c   :  { %v145_v22 = vpack.c.bf16 %v144_v21, %v144_v21 }
 0x11e   :  { %304 = vmatmul.mubr.msk.bf16.vlgmr.msra.gmra.mxu1 %vm92_vm1, %v145_v22 }
 0x1de   :  { %v206_v24 = vpop.f32.mrf.mxu1 }
 0x1df   :  { %v207_v25 = vadd.f32 %v280_v23, %v206_v24 }
 0x1e0   :  { %v305_v26 = vpop.f32.mrf.mxu1 }
 0x1e1   :  { %v212_v27 = vmin.f32 %v207_v25, 20.0 }
 0x1e2   :  { %v209_v28 = vpop.f32.mrf.mxu1 }
 0x1e3   :  { %v213_v29 = vmul.f32 1.442695, %v212_v27 }
 0x1e4   :  { %v306_v30 = vpop.f32.mrf.mxu1 }
 0x1e5   :  { %323 = vpow2.f32 %v213_v29 }
 0x1f2   :  { %v324_v31 = vpop.eup %323 }
 0x1f3   :  { %v215_v32 = vadd.f32 2.0, %v324_v31 }
 0x1f5   :  { %v216_v33 = vmul.f32 %v324_v31, %v215_v32 }
 0x1f7   :  { %v217_v34 = vadd.f32 2.0, %v216_v33 }
 0x1f9   :  { %325 = vrcp.f32 %v217_v34 }
 0x206   :  { %v326_v35 = vpop.eup %325 }
 0x207   :  { %v219_v36 = vmul.f32 %v326_v35, %v216_v33 }
 0x209   :  { %v220_v37 = vmul.f32 %v219_v36, %v207_v25 }
 0x20b   :  { %v221_v38 = vsel %vm92_vm1, %v220_v37, 0.0 }
 0x20c   :  { %v222_v39 = vrot.slane %v221_v38, 4 }
 0x20e   :  { %v223_v40 = vadd.f32 %v222_v39, %v221_v38 }
 0x210   :  { %v224_v41 = vrot.slane %v223_v40, 2 }
 0x212   :  { %v225_v42 = vadd.f32 %v224_v41, %v223_v40 }
 0x214   :  { %v226_v43 = vrot.slane %v225_v42, 1 }
 0x216   :  { %v227_v44 = vadd.f32 %v226_v43, %v225_v42 }
 0x218   :  { %v228_v45 = vmul.f32 0.125, %v227_v44 }
 0x21a   :  { %v229_v46 = vsub.f32 %v220_v37, %v228_v45 }
 0x21c   :  { %v230_v47 = vmul.f32 %v229_v46, %v229_v46 }
 0x21e   :  { %v231_v48 = vsel %vm92_vm1, %v230_v47, 0.0 }
 0x21f   :  { %v232_v49 = vrot.slane %v231_v48, 4 }
 0x221   :  { %v233_v50 = vadd.f32 %v232_v49, %v231_v48 }
 0x223   :  { %v234_v51 = vrot.slane %v233_v50, 2 }
 0x225   :  { %v235_v52 = vadd.f32 %v234_v51, %v233_v50 }
 0x227   :  { %v236_v53 = vrot.slane %v235_v52, 1 }
 0x229   :  { %v237_v54 = vadd.f32 %v236_v53, %v235_v52 }
 0x22b   :  { %v238_v55 = vmul.f32 0.125, %v237_v54 }
 0x22d   :  { %v239_v56 = vmax.f32 %v238_v55, 0.0 }
 0x22f   :  { %v241_v57 = vadd.f32 1e-05, %v239_v56 }
 0x231   :  { %327 = vrsqrt.f32 %v241_v57 }
 0x23e   :  { %v328_v62 = vpop.eup %327 }
 0x23f   :  { %v243_v63 = vmul.f32 %v328_v62, %v240_v60 }
 0x241   :  { %v248_v0 = vrot.slane %v243_v63, %v247_v61 }
 0x243   :  { %v250_v2 = vmul.f32 %v248_v0, %v229_v46 }
 0x245   :  { %v258_v3 = vadd.f32 %v284_v1, %v250_v2 }
 0x247   :  { %259 = vst.msk [vmem:[#allocation8] sm:$0xff] %vm92_vm1, %v258_v3 }
 0x248   :  { %400 = shalt.err (!%p397_p5)
}
 0x249   :  { %269 = dma.vmem_to_hbm [thread:$0]  %s267_s22, 128, %s499_s7, [#allocation4]  }
 0x24a   :  { %413 = dma.done.wait [#allocation4], 128  }
 0x24b   :  { %414 = vsyncadd [#allocation4], 4294967168 }
 0x24c   :  { %273 = vsyncpa [#allocation3], 1 }
 0x24d   :  { %274 = vsyncpa [#allocation6], 1 }
 0x24e   :  { %275 = vsyncpa [#allocation4], 1 }

</bundles_post_ra>
